<compile_context>
chip_gen: v6e
topology: v6e:2x2x1
jax: 0.10.0
libtpu: 0.0.40
codegen_flags: <defaults>
</compile_context>

<pallas_src>
import functools

import jax
import jax.numpy as jnp
from jax.experimental import pallas as pl
from jax.experimental.pallas import tpu as pltpu


def _round_up(x, m):
    return ((x + m - 1) // m) * m


def _pick_row_block(bc_padded):
    # bc_padded is a multiple of 8, so 8 always divides.
    for rb in (64, 32, 16, 8):
        if bc_padded % rb == 0:
            return min(rb, bc_padded)
    return bc_padded


def _tanimoto_sums_kernel(preds_ref, label_ref,
                          sum_l_ref, sum_lp_ref, sum_sq_ref):
    """Accumulate lane-wide partial sums of label, label*pred, label^2+pred^2.

    Grid: (row_block axis [parallel], hw_tile axis [arbitrary/reduction]).
    Output blocks (row_block, 128) are resident accumulators across the
    reduction axis (same block index for every t).
    """
    t = pl.program_id(1)

    @pl.when(t == 0)
    def _():
        sum_l_ref[...] = jnp.zeros_like(sum_l_ref)
        sum_lp_ref[...] = jnp.zeros_like(sum_lp_ref)
        sum_sq_ref[...] = jnp.zeros_like(sum_sq_ref)

    rows, hw_tile = preds_ref.shape
    groups = hw_tile // 128

    acc_l = jnp.zeros((rows, 128), jnp.float32)
    acc_lp = jnp.zeros((rows, 128), jnp.float32)
    acc_sq = jnp.zeros((rows, 128), jnp.float32)

    # Static, aligned 128-lane slices: VPU adds/muls only; the single
    # cross-lane reduce happens once, outside the kernel.
    for j in range(groups):
        ls = label_ref[:, j * 128:(j + 1) * 128].astype(jnp.float32)
        ps = preds_ref[:, j * 128:(j + 1) * 128].astype(jnp.float32)
        acc_l = acc_l + ls
        acc_lp = acc_lp + ls * ps
        acc_sq = acc_sq + ls * ls + ps * ps

    sum_l_ref[...] += acc_l
    sum_lp_ref[...] += acc_lp
    sum_sq_ref[...] += acc_sq


def tanimoto_loss(preds, label_one_hot, *, smooth=1e-5,
                  max_hw_tile=4096, input_buffer_budget=8 << 20):
    """Tanimoto loss for NCHW preds / one-hot labels; returns (B,) float32."""
    B, C, H, W = preds.shape
    HW = H * W
    BC = B * C

    # Keep native dtype (no HBM-side upcast); kernel casts tiles to f32.
    p2 = preds.reshape(BC, HW)
    l2 = label_one_hot.reshape(BC, HW)

    # ---- tiling ------------------------------------------------------------
    BC_p = _round_up(BC, 8)
    row_block = _pick_row_block(BC_p)
    n_row_blocks = BC_p // row_block

    # Largest lane tile such that 2 inputs x 2 pipeline buffers fit the budget.
    bytes_per_col = row_block * (p2.dtype.itemsize + l2.dtype.itemsize)
    cap_cols = max(128, (input_buffer_budget // (2 * bytes_per_col)) // 128 * 128)
    cap_cols = min(cap_cols, max_hw_tile)

    lane_groups_total = pl.cdiv(HW, 128)
    groups_per_tile_cap = max(1, min(cap_cols // 128, lane_groups_total))
    n_tiles = pl.cdiv(lane_groups_total, groups_per_tile_cap)
    groups_per_tile = pl.cdiv(lane_groups_total, n_tiles)
    hw_tile = groups_per_tile * 128
    HW_p = n_tiles * hw_tile

    pad_rows = BC_p - BC
    pad_cols = HW_p - HW
    if pad_rows or pad_cols:
        # Zero padding contributes nothing to any of the partial sums; padded
        # rows are sliced off before the finalize.
        p2 = jnp.pad(p2, ((0, pad_rows), (0, pad_cols)))
        l2 = jnp.pad(l2, ((0, pad_rows), (0, pad_cols)))

    in_block_bytes = row_block * hw_tile * (p2.dtype.itemsize + l2.dtype.itemsize)
    out_block_bytes = 3 * row_block * 128 * 4
    vmem_limit = int(min(64 << 20,
                         max(16 << 20,
                             2 * in_block_bytes + 2 * out_block_bytes + (4 << 20))))

    out_sd = jax.ShapeDtypeStruct((BC_p, 128), jnp.float32)
    in_spec = pl.BlockSpec((row_block, hw_tile), lambda r, t: (r, t))
    acc_spec = pl.BlockSpec((row_block, 128), lambda r, t: (r, 0))

    sum_l, sum_lp, sum_sq = pl.pallas_call(
        _tanimoto_sums_kernel,
        out_shape=(out_sd, out_sd, out_sd),
        grid_spec=pltpu.PrefetchScalarGridSpec(
            num_scalar_prefetch=0,
            grid=(n_row_blocks, n_tiles),
            in_specs=[in_spec, in_spec],
            out_specs=[acc_spec, acc_spec, acc_spec],
        ),
        compiler_params=pltpu.CompilerParams(
            dimension_semantics=("parallel", "arbitrary"),
            vmem_limit_bytes=vmem_limit),
    )(p2, l2)

    # ---- tiny O(B*C) finalize (class weights + Tanimoto ratio) in plain JAX.
    sl = jnp.sum(sum_l[:BC], axis=-1).reshape(B, C)    # sum(label)
    slp = jnp.sum(sum_lp[:BC], axis=-1).reshape(B, C)  # sum(label * preds)
    ssq = jnp.sum(sum_sq[:BC], axis=-1).reshape(B, C)  # sum(label^2 + preds^2)

    Vli = jnp.mean(sl, axis=0)                         # (C,)
    wli = 1.0 / (Vli * Vli + smooth)
    new_w = jnp.where(jnp.isinf(wli), jnp.zeros_like(wli), wli)
    wli = jnp.where(jnp.isinf(wli), jnp.ones_like(wli) * jnp.max(new_w), wli)

    rl_x_pl = slp
    rl_p_pl = ssq - rl_x_pl
    num = jnp.sum(wli[None, :] * rl_x_pl, axis=1) + smooth
    den = jnp.sum(wli[None, :] * rl_p_pl, axis=1) + smooth
    return num / den


def _tanimoto_loss_ref(preds, label_one_hot, smooth=1e-5):
    """Pure-JAX reference mirroring the PyTorch forward exactly."""
    axis = (2, 3)
    Vli = jnp.mean(jnp.sum(label_one_hot, axis=axis), axis=0)
    wli = 1.0 / (Vli ** 2 + smooth)
    new_w = jnp.where(jnp.isinf(wli), jnp.zeros_like(wli), wli)
    wli = jnp.where(jnp.isinf(wli), jnp.ones_like(wli) * jnp.max(new_w), wli)
    rl_x_pl = jnp.sum(label_one_hot * preds, axis=axis)
    l = jnp.sum(label_one_hot ** 2, axis=axis)
    p = jnp.sum(preds ** 2, axis=axis)
    rl_p_pl = l + p - rl_x_pl
    return (jnp.sum(wli * rl_x_pl, axis=1) + smooth) / \
           (jnp.sum(wli * rl_p_pl, axis=1) + smooth)


if __name__ == "__main__":
    B, C, H, W = 2, 4, 16, 16
    key = jax.random.PRNGKey(0)
    k_pred, k_lbl = jax.random.split(key)

    # preds: sigmoid-squashed logits in (0, 1), NCHW
    preds = jax.nn.sigmoid(
        jax.random.normal(k_pred, (B, C, H, W), dtype=jnp.float32))
    # label_one_hot: one-hot over C classes, NCHW
    classes = jax.random.randint(k_lbl, (B, H, W), 0, C)
    label_one_hot = jnp.transpose(
        jax.nn.one_hot(classes, C, dtype=jnp.float32), (0, 3, 1, 2))

    loss_fn = jax.jit(functools.partial(tanimoto_loss, smooth=1e-5))
    out = jax.block_until_ready(loss_fn(preds, label_one_hot))

    ref = _tanimoto_loss_ref(preds, label_one_hot)
    assert out.shape == (B,)
    assert jnp.allclose(out, ref, rtol=1e-5, atol=1e-5), (out, ref)

    print("KERNEL_OK")
</pallas_src>

<mosaic_0001>
module attributes {stable_mosaic.version = 11 : i64} {
  func.func @_tanimoto_sums_kernel(%arg0: i32, %arg1: i32, %arg2: memref<8x256xf32, #tpu.memory_space<vmem>>, %arg3: memref<8x256xf32, #tpu.memory_space<vmem>>, %arg4: memref<8x128xf32, #tpu.memory_space<vmem>>, %arg5: memref<8x128xf32, #tpu.memory_space<vmem>>, %arg6: memref<8x128xf32, #tpu.memory_space<vmem>>) attributes {dimension_semantics = [#tpu.dimension_semantics<parallel>, #tpu.dimension_semantics<arbitrary>], iteration_bounds = array<i64: 1, 1>, scalar_prefetch = 0 : i64, scratch_operands = 0 : i64, tpu.core_type = #tpu.core_type<tc>, window_params = [{transform_indices = @transform_0, window_bounds = array<i64: 8, 256>}, {transform_indices = @transform_1, window_bounds = array<i64: 8, 256>}, {transform_indices = @transform_2, window_bounds = array<i64: 8, 128>}, {transform_indices = @transform_3, window_bounds = array<i64: 8, 128>}, {transform_indices = @transform_4, window_bounds = array<i64: 8, 128>}]} {
    %c0_i32 = arith.constant 0 : i32
    %0 = arith.cmpi eq, %arg1, %c0_i32 : i32
    %1 = arith.extui %0 : i1 to i32
    %c0_i32_0 = arith.constant 0 : i32
    %2 = arith.cmpi ne, %1, %c0_i32_0 : i32
    scf.if %2 {
      %cst_21 = arith.constant 0.000000e+00 : f32
      %33 = vector.broadcast %cst_21 : f32 to vector<8x128xf32>
      %c0_22 = arith.constant 0 : index
      %c0_23 = arith.constant 0 : index
      %34 = vector.load %arg4[%c0_22, %c0_23] : memref<8x128xf32, #tpu.memory_space<vmem>>, vector<8x128xf32>
      tpu.vector_store %arg4[%c0_22, %c0_23], %33 {strides = array<i32>} : memref<8x128xf32, #tpu.memory_space<vmem>>, vector<8x128xf32>,
      %cst_24 = arith.constant 0.000000e+00 : f32
      %35 = vector.broadcast %cst_24 : f32 to vector<8x128xf32>
      %c0_25 = arith.constant 0 : index
      %c0_26 = arith.constant 0 : index
      %36 = vector.load %arg5[%c0_25, %c0_26] : memref<8x128xf32, #tpu.memory_space<vmem>>, vector<8x128xf32>
      tpu.vector_store %arg5[%c0_25, %c0_26], %35 {strides = array<i32>} : memref<8x128xf32, #tpu.memory_space<vmem>>, vector<8x128xf32>,
      %cst_27 = arith.constant 0.000000e+00 : f32
      %37 = vector.broadcast %cst_27 : f32 to vector<8x128xf32>
      %c0_28 = arith.constant 0 : index
      %c0_29 = arith.constant 0 : index
      %38 = vector.load %arg6[%c0_28, %c0_29] : memref<8x128xf32, #tpu.memory_space<vmem>>, vector<8x128xf32>
      tpu.vector_store %arg6[%c0_28, %c0_29], %37 {strides = array<i32>} : memref<8x128xf32, #tpu.memory_space<vmem>>, vector<8x128xf32>,
    } else {
    }
    %cst = arith.constant 0.000000e+00 : f32
    %3 = vector.broadcast %cst : f32 to vector<8x128xf32>
    %cst_1 = arith.constant 0.000000e+00 : f32
    %4 = vector.broadcast %cst_1 : f32 to vector<8x128xf32>
    %cst_2 = arith.constant 0.000000e+00 : f32
    %5 = vector.broadcast %cst_2 : f32 to vector<8x128xf32>
    %c0 = arith.constant 0 : index
    %c0_3 = arith.constant 0 : index
    %6 = vector.load %arg3[%c0, %c0_3] : memref<8x256xf32, #tpu.memory_space<vmem>>, vector<8x128xf32>
    %c0_4 = arith.constant 0 : index
    %c0_5 = arith.constant 0 : index
    %7 = vector.load %arg2[%c0_4, %c0_5] : memref<8x256xf32, #tpu.memory_space<vmem>>, vector<8x128xf32>
    %8 = arith.addf %3, %6 : vector<8x128xf32>
    %9 = arith.mulf %6, %7 : vector<8x128xf32>
    %10 = arith.addf %4, %9 : vector<8x128xf32>
    %11 = arith.mulf %6, %6 : vector<8x128xf32>
    %12 = arith.addf %5, %11 : vector<8x128xf32>
    %13 = arith.mulf %7, %7 : vector<8x128xf32>
    %14 = arith.addf %12, %13 : vector<8x128xf32>
    %c0_6 = arith.constant 0 : index
    %c128 = arith.constant 128 : index
    %15 = vector.load %arg3[%c0_6, %c128] : memref<8x256xf32, #tpu.memory_space<vmem>>, vector<8x128xf32>
    %c0_7 = arith.constant 0 : index
    %c128_8 = arith.constant 128 : index
    %16 = vector.load %arg2[%c0_7, %c128_8] : memref<8x256xf32, #tpu.memory_space<vmem>>, vector<8x128xf32>
    %17 = arith.addf %8, %15 : vector<8x128xf32>
    %18 = arith.mulf %15, %16 : vector<8x128xf32>
    %19 = arith.addf %10, %18 : vector<8x128xf32>
    %20 = arith.mulf %15, %15 : vector<8x128xf32>
    %21 = arith.addf %14, %20 : vector<8x128xf32>
    %22 = arith.mulf %16, %16 : vector<8x128xf32>
    %23 = arith.addf %21, %22 : vector<8x128xf32>
    %c0_9 = arith.constant 0 : index
    %c0_10 = arith.constant 0 : index
    %24 = vector.load %arg4[%c0_9, %c0_10] : memref<8x128xf32, #tpu.memory_space<vmem>>, vector<8x128xf32>
    %25 = arith.addf %24, %17 : vector<8x128xf32>
    %c0_11 = arith.constant 0 : index
    %c0_12 = arith.constant 0 : index
    %26 = vector.load %arg4[%c0_11, %c0_12] : memref<8x128xf32, #tpu.memory_space<vmem>>, vector<8x128xf32>
    tpu.vector_store %arg4[%c0_11, %c0_12], %25 {strides = array<i32>} : memref<8x128xf32, #tpu.memory_space<vmem>>, vector<8x128xf32>,
    %c0_13 = arith.constant 0 : index
    %c0_14 = arith.constant 0 : index
    %27 = vector.load %arg5[%c0_13, %c0_14] : memref<8x128xf32, #tpu.memory_space<vmem>>, vector<8x128xf32>
    %28 = arith.addf %27, %19 : vector<8x128xf32>
    %c0_15 = arith.constant 0 : index
    %c0_16 = arith.constant 0 : index
    %29 = vector.load %arg5[%c0_15, %c0_16] : memref<8x128xf32, #tpu.memory_space<vmem>>, vector<8x128xf32>
    tpu.vector_store %arg5[%c0_15, %c0_16], %28 {strides = array<i32>} : memref<8x128xf32, #tpu.memory_space<vmem>>, vector<8x128xf32>,
    %c0_17 = arith.constant 0 : index
    %c0_18 = arith.constant 0 : index
    %30 = vector.load %arg6[%c0_17, %c0_18] : memref<8x128xf32, #tpu.memory_space<vmem>>, vector<8x128xf32>
    %31 = arith.addf %30, %23 : vector<8x128xf32>
    %c0_19 = arith.constant 0 : index
    %c0_20 = arith.constant 0 : index
    %32 = vector.load %arg6[%c0_19, %c0_20] : memref<8x128xf32, #tpu.memory_space<vmem>>, vector<8x128xf32>
    tpu.vector_store %arg6[%c0_19, %c0_20], %31 {strides = array<i32>} : memref<8x128xf32, #tpu.memory_space<vmem>>, vector<8x128xf32>,
    return
  }
  func.func @transform_0(%arg0: i32, %arg1: i32) -> (i32, i32) {
    %c0_i32 = arith.constant 0 : i32
    return %arg0, %arg1 : i32, i32
  }
  func.func @transform_1(%arg0: i32, %arg1: i32) -> (i32, i32) {
    %c0_i32 = arith.constant 0 : i32
    return %arg0, %arg1 : i32, i32
  }
  func.func @transform_2(%arg0: i32, %arg1: i32) -> (i32, i32) {
    %c0_i32 = arith.constant 0 : i32
    %c0_i32_0 = arith.constant 0 : i32
    return %arg0, %c0_i32 : i32, i32
  }
  func.func @transform_3(%arg0: i32, %arg1: i32) -> (i32, i32) {
    %c0_i32 = arith.constant 0 : i32
    %c0_i32_0 = arith.constant 0 : i32
    return %arg0, %c0_i32 : i32, i32
  }
  func.func @transform_4(%arg0: i32, %arg1: i32) -> (i32, i32) {
    %c0_i32 = arith.constant 0 : i32
    %c0_i32_0 = arith.constant 0 : i32
    return %arg0, %c0_i32 : i32, i32
  }
}

</mosaic_0001>

<bundles_post_ra>
// kernel: tanimoto_loss.1
= control target key start
LH: loop header
LB: loop body
LE: loop exit
PB: predicated region body
PF: predicated region fallthrough
CT: control target
= control target key end

     0   :  { %s107_s1 = inlined_call_operand.vmem [shape: f32[8,256], index: 1, kind: input, shape index: {}]   ;;  %s108_s0 = inlined_call_operand.vmem [shape: f32[8,256], index: 0, kind: input, shape index: {}]   ;;  %s109_s2 = inlined_call_operand.vmem [shape: f32[8,128], index: 2, kind: output, shape index: {0}]   ;;  %s110_s3 = inlined_call_operand.vmem [shape: f32[8,128], index: 3, kind: output, shape index: {1}]   ;;  %s111_s4 = inlined_call_operand.vmem [shape: f32[8,128], index: 4, kind: output, shape index: {2}]  }
   0x1   :  { %v21_v0 = vld [vmem:[%s107_s1] sm:$0xff]  ;;  %v30_v1 = vld [vmem:[%s107_s1 + $0x8] sm:$0xff] }
   0x2   :  { %v22_v2 = vld [vmem:[%s108_s0] sm:$0xff]  ;;  %v26_v3 = vmul.f32 %v21_v0, %v21_v0  ;;  %v32_v4 = vadd.f32 %v30_v1, %v21_v0  ;;  %v31_v7 = vld [vmem:[%s108_s0 + $0x8] sm:$0xff]  ;;  %v35_v9 = vmul.f32 %v30_v1, %v30_v1 }
   0x3   :  { %v24_v5 = vmul.f32 %v22_v2, %v21_v0  ;;  %v28_v6 = vmul.f32 %v22_v2, %v22_v2  ;;  %v33_v8 = vmul.f32 %v31_v7, %v30_v1  ;;  %v37_v11 = vmul.f32 %v31_v7, %v31_v7 }
   0x4   :  { %41 = vst [vmem:[%s109_s2] sm:$0xff] %v32_v4 }
   0x5   :  { %v29_v10 = vadd.f32 %v28_v6, %v26_v3  ;;  %v34_v12 = vadd.f32 %v33_v8, %v24_v5 }
   0x7   :  { %v36_v13 = vadd.f32 %v35_v9, %v29_v10  ;;  %44 = vst [vmem:[%s110_s3] sm:$0xff] %v34_v12 }
   0x9   :  { %v38_v14 = vadd.f32 %v37_v11, %v36_v13 }
   0xb   :  { %47 = vst [vmem:[%s111_s4] sm:$0xff] %v38_v14 }

</bundles_post_ra>
